<compile_context>
chip_gen: v7x
topology: tpu7x:2x2x1
jax: 0.10.0
libtpu: 0.0.40
codegen_flags: <defaults>
</compile_context>

<pallas_src>
import math

import jax
import jax.numpy as jnp
from jax.experimental import pallas as pl
from jax.experimental.pallas import tpu as pltpu

_LANES = 128


def _ia3_kernel(x_ref, v_ref, o_ref):
    # x_ref: (row_tile, col_tile); v_ref: (1, col_tile) broadcast over rows.
    x = x_ref[...].astype(jnp.float32)
    v = v_ref[...].astype(jnp.float32)
    o_ref[...] = (x * v).astype(o_ref.dtype)


def _sublane_quantum(dtype):
    # 8 rows for 4-byte dtypes, 16 for 2-byte, 32 for 1-byte.
    return max(8, 32 // jnp.dtype(dtype).itemsize)


def ia3_elementwise_multiply(x, ia3_vector, *, block_bytes=4 * 1024 * 1024):
    """out = x * ia3_vector, broadcasting the vector over the last dim of x."""
    orig_shape = x.shape
    H = orig_shape[-1]
    assert ia3_vector.shape == (H,), "ia3_vector must match the last dim of x"

    x2d = x.reshape(-1, H)
    R = x2d.shape[0]
    dtype_bytes = jnp.dtype(x.dtype).itemsize
    sub = _sublane_quantum(x.dtype)

    # --- Lane-dense layout ---------------------------------------------------
    # If H is not a multiple of 128, fold `fold` consecutive rows into the lane
    # axis so the last dim is a multiple of 128 (avoids masked partial stores).
    # Broadcast semantics are preserved by tiling the IA3 vector `fold` times.
    fold = 1
    if H % _LANES != 0:
        k = _LANES // math.gcd(H, _LANES)
        if k > 1 and R % k == 0:
            fold = k
    R_eff = R // fold
    H_eff = H * fold
    x_work = x2d.reshape(R_eff, H_eff)  # row-major: pure metadata reshape
    v_work = jnp.tile(ia3_vector, fold).reshape(1, H_eff).astype(jnp.float32)

    # --- Tile selection from a VMEM budget ------------------------------------
    # Column tile: full width unless even a minimal sublane strip blows the
    # per-buffer budget; then split the lane axis into 128-multiples.
    col_tile = H_eff
    if H_eff % _LANES == 0 and sub * H_eff * dtype_bytes > block_bytes:
        col_tile = max(
            _LANES, (block_bytes // (sub * dtype_bytes)) // _LANES * _LANES
        )

    budget_rows = max(sub, (block_bytes // (col_tile * dtype_bytes)) // sub * sub)
    row_tile = R_eff if budget_rows >= R_eff else budget_rows

    grid = (pl.cdiv(R_eff, row_tile), pl.cdiv(H_eff, col_tile))

    # VMEM: double-buffered input + output blocks plus the (tiny) f32 vector.
    vmem_need = 4 * row_tile * col_tile * dtype_bytes + 2 * col_tile * 4
    vmem_limit = int(min(max(2 * vmem_need, 8 << 20), 48 << 20))

    total_bytes = 2 * R_eff * H_eff * dtype_bytes + H_eff * 4  # read x + vec, write out

    out = pl.pallas_call(
        _ia3_kernel,
        out_shape=jax.ShapeDtypeStruct((R_eff, H_eff), x.dtype),
        grid_spec=pltpu.PrefetchScalarGridSpec(
            num_scalar_prefetch=0,
            grid=grid,
            in_specs=[
                pl.BlockSpec((row_tile, col_tile), lambda i, j: (i, j)),
                pl.BlockSpec((1, col_tile), lambda i, j: (0, j)),
            ],
            out_specs=pl.BlockSpec((row_tile, col_tile), lambda i, j: (i, j)),
        ),
        compiler_params=pltpu.CompilerParams(
            dimension_semantics=("parallel", "parallel"),
            vmem_limit_bytes=vmem_limit,
        ),
        cost_estimate=pl.CostEstimate(
            flops=R_eff * H_eff, transcendentals=0, bytes_accessed=total_bytes
        ),
    )(x_work, v_work)

    return out.reshape(orig_shape)


if __name__ == "__main__":
    key = jax.random.PRNGKey(0)

    # --- Small demo shape matching the PyTorch module ------------------------
    batch, seq, hidden = 2, 8, 32
    kx, kv, kx2 = jax.random.split(key, 3)
    x = jax.random.normal(kx, (batch, seq, hidden), dtype=jnp.float32)
    # nn.Parameter(torch.ones(out_features)) plus a small deterministic
    # perturbation so the multiply is non-trivial.
    ia3_vector = jnp.ones((hidden,), dtype=jnp.float32) + 0.01 * jax.random.normal(
        kv, (hidden,), dtype=jnp.float32
    )

    out = ia3_elementwise_multiply(x, ia3_vector)
    out = jax.block_until_ready(out)

    ref = x * ia3_vector
    assert out.shape == x.shape
    assert out.dtype == x.dtype
    assert jnp.allclose(out, ref, atol=1e-6, rtol=1e-6)

    # --- Second check: exercises the multi-step tiled grid path --------------
    b2, s2, h2 = 4, 256, 512
    x2 = jax.random.normal(kx2, (b2, s2, h2), dtype=jnp.float32)
    v2 = jnp.ones((h2,), dtype=jnp.float32) + 0.01 * jax.random.normal(
        kv, (h2,), dtype=jnp.float32
    )
    out2 = ia3_elementwise_multiply(x2, v2, block_bytes=64 * 1024)
    out2 = jax.block_until_ready(out2)
    assert jnp.allclose(out2, x2 * v2, atol=1e-6, rtol=1e-6)

    # --- Third check: bf16 activations with an f32 IA3 vector ----------------
    x3 = jax.random.normal(kx2, (2, 64, 384), dtype=jnp.bfloat16)
    v3 = jnp.ones((384,), dtype=jnp.float32) + 0.01 * jax.random.normal(
        kv, (384,), dtype=jnp.float32
    )
    out3 = jax.block_until_ready(ia3_elementwise_multiply(x3, v3))
    ref3 = (x3.astype(jnp.float32) * v3).astype(jnp.bfloat16)
    assert out3.dtype == jnp.bfloat16
    assert jnp.allclose(
        out3.astype(jnp.float32), ref3.astype(jnp.float32), atol=1e-2, rtol=1e-2
    )

    print("KERNEL_OK")
</pallas_src>

<mosaic_0001>
module attributes {stable_mosaic.version = 11 : i64} {
  func.func @_ia3_kernel(%arg0: i32, %arg1: i32, %arg2: memref<4x128xf32, #tpu.memory_space<vmem>>, %arg3: memref<1x128xf32, #tpu.memory_space<vmem>>, %arg4: memref<4x128xf32, #tpu.memory_space<vmem>>) attributes {dimension_semantics = [#tpu.dimension_semantics<parallel>, #tpu.dimension_semantics<parallel>], iteration_bounds = array<i64: 1, 1>, scalar_prefetch = 0 : i64, scratch_operands = 0 : i64, tpu.core_type = #tpu.core_type<tc>, window_params = [{transform_indices = @transform_0, window_bounds = array<i64: 4, 128>}, {transform_indices = @transform_1, window_bounds = array<i64: 1, 128>}, {transform_indices = @transform_2, window_bounds = array<i64: 4, 128>}]} {
    %c0 = arith.constant 0 : index
    %c0_0 = arith.constant 0 : index
    %0 = vector.load %arg2[%c0, %c0_0] : memref<4x128xf32, #tpu.memory_space<vmem>>, vector<4x128xf32>
    %c0_1 = arith.constant 0 : index
    %c0_2 = arith.constant 0 : index
    %1 = vector.load %arg3[%c0_1, %c0_2] : memref<1x128xf32, #tpu.memory_space<vmem>>, vector<1x128xf32>
    %2 = vector.broadcast %1 : vector<1x128xf32> to vector<4x128xf32>
    %3 = arith.mulf %0, %2 : vector<4x128xf32>
    %c0_3 = arith.constant 0 : index
    %c0_4 = arith.constant 0 : index
    %4 = vector.load %arg4[%c0_3, %c0_4] : memref<4x128xf32, #tpu.memory_space<vmem>>, vector<4x128xf32>
    tpu.vector_store %arg4[%c0_3, %c0_4], %3 {strides = array<i32>} : memref<4x128xf32, #tpu.memory_space<vmem>>, vector<4x128xf32>,
    return
  }
  func.func @transform_0(%arg0: i32, %arg1: i32) -> (i32, i32) {
    %c0_i32 = arith.constant 0 : i32
    return %arg0, %arg1 : i32, i32
  }
  func.func @transform_1(%arg0: i32, %arg1: i32) -> (i32, i32) {
    %c0_i32 = arith.constant 0 : i32
    %c0_i32_0 = arith.constant 0 : i32
    return %c0_i32, %arg1 : i32, i32
  }
  func.func @transform_2(%arg0: i32, %arg1: i32) -> (i32, i32) {
    %c0_i32 = arith.constant 0 : i32
    return %arg0, %arg1 : i32, i32
  }
}

</mosaic_0001>

<bundles_post_ra>
// kernel: tpu_custom_call.1
= control target key start
LH: loop header
LB: loop body
LE: loop exit
PB: predicated region body
PF: predicated region fallthrough
CT: control target
= control target key end

     0   :  { %7 = vsyncpa [#allocation3], 0  ;;  %s144_s0 = inlined_call_operand.hbm [shape: f32[4,128], index: 0, kind: input, shape index: {}]   ;;  %s145_s1 = inlined_call_operand.vmem [shape: f32[1,128], index: 1, kind: input, shape index: {}]   ;;  %s146_s2 = inlined_call_operand.hbm [shape: f32[4,128], index: 2, kind: output, shape index: {}]  }
   0x1   :  { %8 = vsyncpa [#allocation4], 0  ;;  %s100_s9 = smov [#allocation2]   ;;  %s52_s13 = scalar_lea.hbm %s144_s0, 64 }
   0x2   :  { %s15_s10 = sshll.u32 %s100_s9, 4  ;;  %p53_p0 = scmp.ne.s32.totalorder %s144_s0, %s52_s13  ;;  %s16_s10 = int_to_ptr.vmem [resolvable:$true] %s15_s10 }
   0x3   :  { %p56_p1 = scmp.lt.u32.totalorder %s52_s13, %s144_s0 }
   0x5   :  { %p58_p2 = pnand %p56_p1, %p53_p0 }
   0x7   :  { %61 = shalt.err (!%p58_p2)
}
   0x8   :  { %s62_s18 = scalar_lea.vmem %s16_s10, 64  ;;  %p67_p4 = scmp.lt.s32.totalorder %s16_s10, %s16_s10 }
   0x9   :  { %p63_p3 = scmp.ne.s32.totalorder %s16_s10, %s62_s18  ;;  %p68_p5 = scmp.lt.s32.totalorder %s62_s18, %s62_s18 }
   0xb   :  { %p69_p6 = por %p68_p5, %p67_p4 }
   0xd   :  { %p70_p7 = pnand %p69_p6, %p63_p3 }
   0xf   :  { %73 = shalt.err (!%p70_p7)
}
  0x10   :  { %18 = dma.hbm_to_vmem [thread:$0]  %s144_s0, 64, %s16_s10, [#allocation3]  }
  0x11   :  { %96 = dma.done.wait [#allocation3], 64  }
  0x12   :  { %97 = vsyncadd [#allocation3], 4294967232  ;;  %s101_s21 = smov [#allocation5]   ;;  %v24_v0 = vld [vmem:[#allocation2] sm:$0xf] }
  0x13   :  { %s40_s22 = sshll.u32 %s101_s21, 4  ;;  %v49_v1 = vld [vmem:[%s145_s1] ss:$0 sm:$0xff]  ;;  %s41_s22 = int_to_ptr.vmem [resolvable:$true] %s40_s22 }
  0x14   :  { %v32_v2 = vmul.f32 %v49_v1, %v24_v0  ;;  %s74_s25 = scalar_lea.vmem %s41_s22, 64  ;;  %p79_p9 = scmp.lt.s32.totalorder %s41_s22, %s41_s22 }
  0x15   :  { %p75_p8 = scmp.ne.s32.totalorder %s41_s22, %s74_s25  ;;  %p80_p10 = scmp.lt.s32.totalorder %s74_s25, %s74_s25 }
  0x16   :  { %33 = vst [vmem:[#allocation5] sm:$0xf] %v32_v2 }
  0x17   :  { %p81_p11 = por %p80_p10, %p79_p9 }
  0x19   :  { %p82_p12 = pnand %p81_p11, %p75_p8 }
  0x1b   :  { %85 = shalt.err (!%p82_p12)
}
  0x1c   :  { %s86_s27 = scalar_lea.hbm %s146_s2, 64 }
  0x1d   :  { %p87_p13 = scmp.ne.s32.totalorder %s146_s2, %s86_s27  ;;  %p90_p0 = scmp.lt.u32.totalorder %s86_s27, %s146_s2 }
  0x1f   :  { %p92_p1 = pnand %p90_p0, %p87_p13 }
  0x21   :  { %95 = shalt.err (!%p92_p1)
}
  0x22   :  { %43 = dma.vmem_to_hbm [thread:$0]  %s41_s22, 64, %s146_s2, [#allocation4]  }
  0x23   :  { %98 = dma.done.wait [#allocation4], 64  }
  0x24   :  { %99 = vsyncadd [#allocation4], 4294967232 }
  0x25   :  { %47 = vsyncpa [#allocation3], 1 }
  0x26   :  { %48 = vsyncpa [#allocation4], 1 }

</bundles_post_ra>
